<compile_context>
chip_gen: v7x
topology: tpu7x:2x2x1
jax: 0.10.0
libtpu: 0.0.40
codegen_flags: <defaults>
</compile_context>

<pallas_src>
import functools

import jax
import jax.numpy as jnp
from jax import lax
from jax.experimental import pallas as pl
from jax.experimental.pallas import tpu as pltpu

_LANES = 128
_SUBLANES = 8
# (4096,128) f32 tile = 2 MiB; two f32 inputs + 1-byte mask, double-buffered,
# is ~9 MiB of VMEM -> fits every chip's scoped-VMEM default (16 MiB on v5e).
_MAX_TILE_ROWS = 4096


def _cdiv(a, b):
    return -(-a // b)


def _round_up(a, b):
    return _cdiv(a, b) * b


def _masked_mse_kernel(pred_ref, true_ref, mask_ref, sum_ref, cnt_ref, *,
                       tile_rows, rows, steps_per_core, needs_row_mask):
    c = pl.program_id(0)
    i = pl.program_id(1)

    @pl.when(i == 0)
    def _():
        sum_ref[...] = jnp.zeros_like(sum_ref)
        cnt_ref[...] = jnp.zeros_like(cnt_ref)

    raw = mask_ref[...]
    m = raw if raw.dtype == jnp.bool_ else (raw != 0)

    def accumulate(valid):
        p = pred_ref[...].astype(jnp.float32)
        t = true_ref[...].astype(jnp.float32)
        d = p - t
        sq = jnp.where(valid, d * d, jnp.float32(0.0))
        cnt = valid.astype(jnp.float32)
        if tile_rows > _SUBLANES:
            # Per-vreg VALU adds down to a single (8,128) vreg; no XLU, and the
            # resident accumulator (the output block) is a single vreg each.
            sq = sq.reshape(tile_rows // _SUBLANES, _SUBLANES, _LANES).sum(axis=0)
            cnt = cnt.reshape(tile_rows // _SUBLANES, _SUBLANES, _LANES).sum(axis=0)
        sum_ref[...] += sq
        cnt_ref[...] += cnt

    if not needs_row_mask:
        accumulate(m)
    else:
        # Only boundary / fully out-of-range blocks pay for the iota/compare
        # row mask; interior blocks take the cheap path.
        gblk = c * steps_per_core + i
        valid_rows = rows - gblk * tile_rows  # scalar; may be <= 0

        @pl.when(valid_rows >= tile_rows)
        def _():
            accumulate(m)

        @pl.when(valid_rows < tile_rows)
        def _():
            rid = lax.broadcasted_iota(jnp.int32, (tile_rows, _LANES), 0)
            accumulate(jnp.logical_and(m, rid < valid_rows))


@jax.jit
def masked_mse_loss(y_pred, y_true, mask):
    """Masked MSE loss (reduction='mean') computed in a Pallas TPU kernel."""
    assert y_pred.shape == y_true.shape == mask.shape
    n = int(y_pred.size)
    if n == 0:
        return jnp.float32(jnp.nan)  # mean over an empty selection

    pred_f = jnp.ravel(y_pred)
    true_f = jnp.ravel(y_true)
    mask_f = jnp.ravel(mask)
    if jnp.dtype(mask_f.dtype).itemsize != 1:
        # Only pay a conversion pass when the mask isn't already 1 byte/elem.
        mask_f = mask_f != 0

    # 1024-aligned bulk goes through the kernel (free reshape, rows % 8 == 0);
    # the <=1023-element ragged tail is folded in with a tiny jnp expression
    # instead of jnp.pad-ing full copies of all three arrays.
    n_bulk = (n // (_SUBLANES * _LANES)) * (_SUBLANES * _LANES)
    tail = n - n_bulk

    tail_sum = jnp.float32(0.0)
    tail_cnt = jnp.float32(0.0)
    if tail:
        tp = pred_f[n_bulk:].astype(jnp.float32)
        tt = true_f[n_bulk:].astype(jnp.float32)
        tm_raw = mask_f[n_bulk:]
        tm = tm_raw if tm_raw.dtype == jnp.bool_ else (tm_raw != 0)
        td = tp - tt
        tail_sum = jnp.sum(jnp.where(tm, td * td, jnp.float32(0.0)))
        tail_cnt = jnp.sum(tm.astype(jnp.float32))

    if n_bulk == 0:
        # Too small for a useful kernel launch; the tail term already covers it.
        return tail_sum / tail_cnt

    rows = n_bulk // _LANES  # multiple of 8, >= 8

    def _bulk2d(x):
        if tail:
            x = x[:n_bulk]
        return x.reshape(rows, _LANES)

    pred2d = _bulk2d(pred_f)   # native dtype, no f32 upcast in the wrapper
    true2d = _bulk2d(true_f)
    mask2d = _bulk2d(mask_f)   # bool / 1-byte int streamed as-is

    # --- tiling / core split -------------------------------------------------
    if rows >= 2 * _SUBLANES:
        # Always present two parallel chunks: ~free on 1-TC chips (grid just
        # serializes) and gives v7x's two TensorCores independent halves.
        ncores = 2
        steps = max(1, _cdiv(_cdiv(rows, _MAX_TILE_ROWS), 2))
    else:
        ncores, steps = 1, 1
    launched = ncores * steps
    tile_rows = min(_round_up(_cdiv(rows, launched), _SUBLANES), _MAX_TILE_ROWS)
    covered = launched * tile_rows           # >= rows; overhang < 8 * launched
    needs_row_mask = covered != rows
    last_block = _cdiv(rows, tile_rows) - 1  # highest block with any valid rows

    if needs_row_mask:
        def blk_index(c, i):
            return (jnp.minimum(c * steps + i, last_block), 0)
    else:
        def blk_index(c, i):
            return (c * steps + i, 0)

    in_spec = pl.BlockSpec((tile_rows, _LANES), blk_index)
    out_spec = pl.BlockSpec((_SUBLANES, _LANES), lambda c, i: (c, 0))

    def _nbytes(a):
        return a.size * jnp.dtype(a.dtype).itemsize

    cost = pl.CostEstimate(
        flops=5 * n_bulk,
        transcendentals=0,
        bytes_accessed=(_nbytes(pred2d) + _nbytes(true2d) + _nbytes(mask2d)
                        + 2 * ncores * _SUBLANES * _LANES * 4),
    )

    kernel = functools.partial(
        _masked_mse_kernel,
        tile_rows=tile_rows,
        rows=rows,
        steps_per_core=steps,
        needs_row_mask=needs_row_mask,
    )

    sum_part, cnt_part = pl.pallas_call(
        kernel,
        out_shape=(
            jax.ShapeDtypeStruct((ncores * _SUBLANES, _LANES), jnp.float32),
            jax.ShapeDtypeStruct((ncores * _SUBLANES, _LANES), jnp.float32),
        ),
        grid_spec=pltpu.PrefetchScalarGridSpec(
            num_scalar_prefetch=0,
            grid=(ncores, steps),
            in_specs=[in_spec, in_spec, in_spec],
            out_specs=[out_spec, out_spec],
        ),
        compiler_params=pltpu.CompilerParams(
            dimension_semantics=("parallel", "arbitrary")),
        cost_estimate=cost,
    )(pred2d, true2d, mask2d)

    total_sum = jnp.sum(sum_part) + tail_sum
    total_cnt = jnp.sum(cnt_part) + tail_cnt
    # 0/0 -> nan for an all-False mask, matching PyTorch.
    return total_sum / total_cnt


def _reference(y_pred, y_true, mask):
    return jnp.sum(jnp.where(mask, (y_pred - y_true) ** 2, 0.0)) / jnp.sum(
        mask.astype(jnp.float32))


if __name__ == "__main__":
    key = jax.random.PRNGKey(0)
    k1, k2, k3, k4, k5, k6 = jax.random.split(key, 6)

    # Primary example: NCHW-like shape, size divisible by 1024 (pure kernel path).
    shape = (2, 4, 16, 16)
    y_pred = jax.random.normal(k1, shape, dtype=jnp.float32)
    y_true = jax.random.normal(k2, shape, dtype=jnp.float32)
    mask = jax.random.bernoulli(k3, p=0.7, shape=shape)

    loss = masked_mse_loss(y_pred, y_true, mask)
    jax.block_until_ready(loss)
    ref = _reference(y_pred, y_true, mask)
    assert jnp.allclose(loss, ref, rtol=1e-5, atol=1e-6), (loss, ref)

    # Ragged regression check: exercises the two-block split, the boundary
    # row mask and the <1024-element wrapper tail.
    shape2 = (5, 40, 26)  # 5200 elements -> 5120-element bulk + 80-element tail
    y_pred2 = jax.random.normal(k4, shape2, dtype=jnp.float32)
    y_true2 = jax.random.normal(k5, shape2, dtype=jnp.float32)
    mask2 = jax.random.bernoulli(k6, p=0.5, shape=shape2)

    loss2 = masked_mse_loss(y_pred2, y_true2, mask2)
    jax.block_until_ready(loss2)
    ref2 = _reference(y_pred2, y_true2, mask2)
    assert jnp.allclose(loss2, ref2, rtol=1e-5, atol=1e-6), (loss2, ref2)

    print("KERNEL_OK")
</pallas_src>

<mosaic_0001>
module attributes {stable_mosaic.version = 11 : i64} {
  func.func @_masked_mse_kernel(%arg0: i32, %arg1: i32, %arg2: memref<8x128xf32, #tpu.memory_space<vmem>>, %arg3: memref<8x128xf32, #tpu.memory_space<vmem>>, %arg4: memref<8x128xi32, #tpu.memory_space<vmem>>, %arg5: memref<8x128xf32, #tpu.memory_space<vmem>>, %arg6: memref<8x128xf32, #tpu.memory_space<vmem>>) attributes {dimension_semantics = [#tpu.dimension_semantics<parallel>, #tpu.dimension_semantics<arbitrary>], iteration_bounds = array<i64: 2, 1>, scalar_prefetch = 0 : i64, scratch_operands = 0 : i64, tpu.core_type = #tpu.core_type<tc>, window_params = [{transform_indices = @transform_0, window_bounds = array<i64: 8, 128>}, {transform_indices = @transform_1, window_bounds = array<i64: 8, 128>}, {transform_indices = @transform_2, window_bounds = array<i64: 8, 128>}, {transform_indices = @transform_3, window_bounds = array<i64: 8, 128>}, {transform_indices = @transform_4, window_bounds = array<i64: 8, 128>}]} {
    %c0_i32 = arith.constant 0 : i32
    %0 = arith.cmpi eq, %arg1, %c0_i32 : i32
    %1 = arith.extui %0 : i1 to i32
    %c0_i32_0 = arith.constant 0 : i32
    %2 = arith.cmpi ne, %1, %c0_i32_0 : i32
    scf.if %2 {
      %cst_15 = arith.constant 0.000000e+00 : f32
      %19 = vector.broadcast %cst_15 : f32 to vector<8x128xf32>
      %c0_16 = arith.constant 0 : index
      %c0_17 = arith.constant 0 : index
      %20 = vector.load %arg5[%c0_16, %c0_17] : memref<8x128xf32, #tpu.memory_space<vmem>>, vector<8x128xf32>
      tpu.vector_store %arg5[%c0_16, %c0_17], %19 {strides = array<i32>} : memref<8x128xf32, #tpu.memory_space<vmem>>, vector<8x128xf32>,
      %cst_18 = arith.constant 0.000000e+00 : f32
      %21 = vector.broadcast %cst_18 : f32 to vector<8x128xf32>
      %c0_19 = arith.constant 0 : index
      %c0_20 = arith.constant 0 : index
      %22 = vector.load %arg6[%c0_19, %c0_20] : memref<8x128xf32, #tpu.memory_space<vmem>>, vector<8x128xf32>
      tpu.vector_store %arg6[%c0_19, %c0_20], %21 {strides = array<i32>} : memref<8x128xf32, #tpu.memory_space<vmem>>, vector<8x128xf32>,
    } else {
    }
    %c0 = arith.constant 0 : index
    %c0_1 = arith.constant 0 : index
    %3 = vector.load %arg4[%c0, %c0_1] : memref<8x128xi32, #tpu.memory_space<vmem>>, vector<8x128xi32>
    %cst = arith.constant dense<0> : vector<8x128xi32>
    %4 = arith.cmpi ne, %3, %cst : vector<8x128xi32>
    %c0_2 = arith.constant 0 : index
    %c0_3 = arith.constant 0 : index
    %5 = vector.load %arg2[%c0_2, %c0_3] : memref<8x128xf32, #tpu.memory_space<vmem>>, vector<8x128xf32>
    %c0_4 = arith.constant 0 : index
    %c0_5 = arith.constant 0 : index
    %6 = vector.load %arg3[%c0_4, %c0_5] : memref<8x128xf32, #tpu.memory_space<vmem>>, vector<8x128xf32>
    %7 = arith.subf %5, %6 : vector<8x128xf32>
    %8 = arith.mulf %7, %7 : vector<8x128xf32>
    %cst_6 = arith.constant 0.000000e+00 : f32
    %9 = vector.broadcast %cst_6 : f32 to vector<8x128xf32>
    %10 = arith.select %4, %8, %9 : vector<8x128xi1>, vector<8x128xf32>
    %11 = arith.extui %4 : vector<8x128xi1> to vector<8x128xi32>
    %12 = arith.sitofp %11 : vector<8x128xi32> to vector<8x128xf32>
    %c0_7 = arith.constant 0 : index
    %c0_8 = arith.constant 0 : index
    %13 = vector.load %arg5[%c0_7, %c0_8] : memref<8x128xf32, #tpu.memory_space<vmem>>, vector<8x128xf32>
    %14 = arith.addf %13, %10 : vector<8x128xf32>
    %c0_9 = arith.constant 0 : index
    %c0_10 = arith.constant 0 : index
    %15 = vector.load %arg5[%c0_9, %c0_10] : memref<8x128xf32, #tpu.memory_space<vmem>>, vector<8x128xf32>
    tpu.vector_store %arg5[%c0_9, %c0_10], %14 {strides = array<i32>} : memref<8x128xf32, #tpu.memory_space<vmem>>, vector<8x128xf32>,
    %c0_11 = arith.constant 0 : index
    %c0_12 = arith.constant 0 : index
    %16 = vector.load %arg6[%c0_11, %c0_12] : memref<8x128xf32, #tpu.memory_space<vmem>>, vector<8x128xf32>
    %17 = arith.addf %16, %12 : vector<8x128xf32>
    %c0_13 = arith.constant 0 : index
    %c0_14 = arith.constant 0 : index
    %18 = vector.load %arg6[%c0_13, %c0_14] : memref<8x128xf32, #tpu.memory_space<vmem>>, vector<8x128xf32>
    tpu.vector_store %arg6[%c0_13, %c0_14], %17 {strides = array<i32>} : memref<8x128xf32, #tpu.memory_space<vmem>>, vector<8x128xf32>,
    return
  }
  func.func @transform_0(%arg0: i32, %arg1: i32) -> (i32, i32) {
    %c1_i32 = arith.constant 1 : i32
    %0 = arith.muli %arg0, %c1_i32 : i32
    %1 = arith.addi %0, %arg1 : i32
    %c0_i32 = arith.constant 0 : i32
    %c0_i32_0 = arith.constant 0 : i32
    return %1, %c0_i32 : i32, i32
  }
  func.func @transform_1(%arg0: i32, %arg1: i32) -> (i32, i32) {
    %c1_i32 = arith.constant 1 : i32
    %0 = arith.muli %arg0, %c1_i32 : i32
    %1 = arith.addi %0, %arg1 : i32
    %c0_i32 = arith.constant 0 : i32
    %c0_i32_0 = arith.constant 0 : i32
    return %1, %c0_i32 : i32, i32
  }
  func.func @transform_2(%arg0: i32, %arg1: i32) -> (i32, i32) {
    %c1_i32 = arith.constant 1 : i32
    %0 = arith.muli %arg0, %c1_i32 : i32
    %1 = arith.addi %0, %arg1 : i32
    %c0_i32 = arith.constant 0 : i32
    %c0_i32_0 = arith.constant 0 : i32
    return %1, %c0_i32 : i32, i32
  }
  func.func @transform_3(%arg0: i32, %arg1: i32) -> (i32, i32) {
    %c0_i32 = arith.constant 0 : i32
    %c0_i32_0 = arith.constant 0 : i32
    return %arg0, %c0_i32 : i32, i32
  }
  func.func @transform_4(%arg0: i32, %arg1: i32) -> (i32, i32) {
    %c0_i32 = arith.constant 0 : i32
    %c0_i32_0 = arith.constant 0 : i32
    return %arg0, %c0_i32 : i32, i32
  }
}

</mosaic_0001>

<bundles_post_ra>
// kernel: masked_mse_loss.1
= control target key start
LH: loop header
LB: loop body
LE: loop exit
PB: predicated region body
PF: predicated region fallthrough
CT: control target
= control target key end

     0   :  { %s496_s15 = smov 0   ;;  %s498_s16 = smov 0   ;;  %s535_s0 = inlined_call_operand.vmem [shape: f32[16,128], index: 0, kind: input, shape index: {}]   ;;  %s536_s1 = inlined_call_operand.vmem [shape: f32[16,128], index: 1, kind: input, shape index: {}]   ;;  %s537_s2 = inlined_call_operand.vmem [shape: s32[16,128], index: 2, kind: input, shape index: {}]   ;;  %s538_s3 = inlined_call_operand.vmem [shape: f32[16,128], index: 3, kind: output, shape index: {0}]   ;;  %s539_s4 = inlined_call_operand.vmem [shape: f32[16,128], index: 4, kind: output, shape index: {1}]  }
   0x1   :  { %s500_s17 = smov 0  }
   0x2 LB: > { %s27_s18 = sadd.s32 1, %s464_s16  ;;  %p412_p0 = scmp.ge.s32.totalorder %s468_s17, 1  ;;  %s468_s17 = sphi %s500_s17, %s15_s17   ;;  %s464_s16 = sphi %s498_s16, %s541_s16   ;;  %s460_s15 = sphi %s496_s15, %s540_s15  }
   0x3   : > { %p29_p1 = scmp.ge.s32.totalorder %s27_s18, 2  ;;  %p206_p2 = scmp.lt.s32.totalorder %s468_s17, 3 }
   0x5   : > { %s543_s18 = smov (%p29_p1, %s27_s18), 0  ;;  %p207_p3 = pnand %p412_p0, %p206_p2 }
   0x6   : > { %p246_p4 = scmp.lt.s32.totalorder (!%p207_p3), %s460_s15, 1  ;;  %v470_v2 = vmov (!%p207_p3), 0.0  }
   0x7   : > { %210 = sbr.rel (%p207_p3) target bundleno = 26 (0x1a), region = 32 }
   0xe   : > { %s545_s15 = smov (!%p246_p4, %s460_s15), 1 }
   0xf   : > { %s413_s19 = sshll.u32 %s545_s15, 3 }
  0x10   : > { %s261_s22 = scalar_lea.vmem %s537_s2, %s413_s19  ;;  %s249_s25 = scalar_lea.vmem %s535_s0, %s413_s19 }
  0x11   : > { %v277_v0 = vld [vmem:[%s261_s22] sm:$0xff]  ;;  %s255_s28 = scalar_lea.vmem %s536_s1, %s413_s19  ;;  %s270_s5 = scalar_lea.vmem %s539_s4, %s413_s19 }
  0x12   : > { %vm278_vm0 = vcmp.ne.s32.totalorder %v277_v0, 0  ;;  %v279_v1 = vld [vmem:[%s249_s25] sm:$0xff]  ;;  %s266_s8 = scalar_lea.vmem %s538_s3, %s413_s19 }
  0x13   : > { %v418_v3 = vsel %vm278_vm0, 1.0, %v470_v2  ;;  %v280_v4 = vld [vmem:[%s255_s28] sm:$0xff] }
  0x14   : > { %v281_v5 = vsub.f32 %v279_v1, %v280_v4  ;;  %291 = vst [vmem:[%s270_s5] sm:$0xff] %v418_v3 }
  0x16   : > { %v282_v6 = vmul.f32 %v281_v5, %v281_v5 }
  0x18   : > { %v283_v7 = vsel %vm278_vm0, %v282_v6, 0.0 }
  0x19   : > { %288 = vst [vmem:[%s266_s8] sm:$0xff] %v283_v7 }
  0x1a PF: > { %s15_s17 = sadd.s32 1, %s468_s17   ;;  %s540_s15 = smov %s464_s16 }
  0x1b   : > { %p12_p5 = scmp.ge.s32.totalorder %s15_s17, 4   ;;  %s541_s16 = smov %s543_s18 }
  0x1d   :  { %14 = sbr.rel (!%p12_p5) target bundleno = 2 (0x2), region = 84 }

</bundles_post_ra>
